<compile_context>
chip_gen: v6e
topology: v6e:2x2x1
jax: 0.10.0
libtpu: 0.0.40
codegen_flags: <defaults>
</compile_context>

<pallas_src>
import functools

import jax
import jax.numpy as jnp
import numpy as np
from jax.experimental import pallas as pl
from jax.experimental.pallas import tpu as pltpu


# --------------------------------------------------------------------------
# pltpu.roll direction probe
# --------------------------------------------------------------------------
# The column taps need "previous element" / "next element" shifts.  To make the
# kernel immune to the rotate-direction convention, probe it once: roll a known
# ramp by 1 along the sublane axis and see which way the data moved.

def _roll_probe_kernel(x_ref, o_ref):
    o_ref[...] = pltpu.roll(x_ref[...], shift=1, axis=0)


@functools.lru_cache(maxsize=None)
def _roll_moves_to_higher_index() -> bool:
    """True iff pltpu.roll(x, 1, axis=0)[i] == x[i-1] (jnp.roll convention)."""
    with jax.ensure_compile_time_eval():
        x = jnp.tile(jnp.arange(8, dtype=jnp.float32)[:, None], (1, 128))
        y = pl.pallas_call(
            _roll_probe_kernel,
            out_shape=jax.ShapeDtypeStruct((8, 128), jnp.float32),
        )(x)
        return bool(y[1, 0] == 0.0)


# --------------------------------------------------------------------------
# Kernel
# --------------------------------------------------------------------------

def _bottleneck_kernel(x_ref, wcat_ref, s1_ref, b1_ref,
                       w2_ref, s2_ref, b2_ref,
                       w3_ref, s3_ref, b3_ref,
                       ssc_ref, bsc_ref,
                       o_ref,
                       *, shift_prev, shift_next):
    _, H, W, Cin = x_ref.shape
    P = w2_ref.shape[2]            # planes
    Cout = w3_ref.shape[1]         # 4 * planes
    HW = H * W

    x = x_ref[0].reshape(HW, Cin)                                      # bf16 (HW, Cin)

    # ---- fused 1x1 convs: projection shortcut (wsc) + conv1 (w1) share x ----
    y = jnp.dot(x, wcat_ref[...], preferred_element_type=jnp.float32)  # (HW, Cout + P)
    sc = y[:, :Cout] * ssc_ref[...] + bsc_ref[...]                     # shortcut conv bias folded into bsc
    h1 = jnp.maximum(y[:, Cout:] * s1_ref[...] + b1_ref[...], 0.0)     # f32 (HW, P)

    # ---- conv2: 3x3, padding=1, stride=1 -------------------------------------
    # Zero-pad along H only (leading-dim concat -> fully aligned), flatten to
    # ((H+2)*W, P) and build the +/-1 column taps with an XLU sublane roll plus a
    # column mask.  The H padding rows guarantee every masked / wrapped position
    # is exactly the conv's zero padding.
    zrow = jnp.zeros((1, W, P), jnp.float32)
    padded = jnp.concatenate([zrow, h1.reshape(H, W, P), zrow], axis=0)  # (H+2, W, P)
    pflat = padded.reshape((H + 2) * W, P)
    col = jax.lax.broadcasted_iota(jnp.int32, ((H + 2) * W, 1), 0) % W
    zero = jnp.zeros_like(pflat)
    left = jnp.where(col == 0, zero,
                     pltpu.roll(pflat, shift=shift_prev, axis=0))       # value at column w-1
    right = jnp.where(col == W - 1, zero,
                      pltpu.roll(pflat, shift=shift_next, axis=0))      # value at column w+1
    left = left.reshape(H + 2, W, P)
    right = right.reshape(H + 2, W, P)

    acc = jnp.zeros((HW, P), jnp.float32)
    for dy in range(3):
        # Fold the three dx taps into a single K = 3P matmul.  Rows of w2_ref[dy]
        # are ordered [dx=0 | dx=1 | dx=2], matching the lhs concat below.
        lhs = jnp.concatenate(
            [left[dy:dy + H].reshape(HW, P),
             padded[dy:dy + H].reshape(HW, P),
             right[dy:dy + H].reshape(HW, P)],
            axis=1).astype(jnp.bfloat16)                                 # (HW, 3P)
        acc = acc + jnp.dot(lhs, w2_ref[dy], preferred_element_type=jnp.float32)
    h2 = jnp.maximum(acc * s2_ref[...] + b2_ref[...], 0.0).astype(jnp.bfloat16)

    # ---- conv3 (1x1) + bn3, residual add, final relu -------------------------
    h3 = jnp.dot(h2, w3_ref[...], preferred_element_type=jnp.float32)
    h3 = h3 * s3_ref[...] + b3_ref[...]

    out = jnp.maximum(h3 + sc, 0.0)
    o_ref[0] = out.reshape(H, W, Cout).astype(o_ref.dtype)


# --------------------------------------------------------------------------
# Wrappers
# --------------------------------------------------------------------------

def bottleneck_nhwc(x_nhwc, kernel_params):
    """x_nhwc: (N, H, W, Cin), f32 or bf16.  Returns (N, H, W, 4*planes) f32."""
    N, H, W, Cin = x_nhwc.shape
    wcat, s1, b1, w2k, s2, b2, w3, s3, b3, ssc, bsc = kernel_params
    P = w2k.shape[2]
    Cout = w3.shape[1]
    assert W % 8 == 0, "W must be a multiple of 8 (sublane tiling of the reshapes)"
    assert wcat.shape == (Cin, Cout + P)

    n_flat = (H + 2) * W
    if _roll_moves_to_higher_index():
        shift_prev, shift_next = 1, n_flat - 1
    else:
        shift_prev, shift_next = n_flat - 1, 1

    kernel = functools.partial(_bottleneck_kernel,
                               shift_prev=shift_prev, shift_next=shift_next)

    x_bf16 = x_nhwc.astype(jnp.bfloat16)   # halves input DMA bytes

    full = lambda a: pl.BlockSpec(a.shape, lambda b: (0,) * a.ndim)
    grid_spec = pltpu.PrefetchScalarGridSpec(
        num_scalar_prefetch=0,
        grid=(N,),
        in_specs=[
            pl.BlockSpec((1, H, W, Cin), lambda b: (b, 0, 0, 0)),
            full(wcat), full(s1), full(b1),
            full(w2k), full(s2), full(b2),
            full(w3), full(s3), full(b3),
            full(ssc), full(bsc),
        ],
        out_specs=pl.BlockSpec((1, H, W, Cout), lambda b: (b, 0, 0, 0)),
    )

    return pl.pallas_call(
        kernel,
        out_shape=jax.ShapeDtypeStruct((N, H, W, Cout), jnp.float32),
        grid_spec=grid_spec,
        compiler_params=pltpu.CompilerParams(
            dimension_semantics=("parallel",),        # batch images are independent
            vmem_limit_bytes=32 * 1024 * 1024),       # explicit budget (safe on v5e/v6e/v7x)
    )(x_bf16, wcat, s1, b1, w2k, s2, b2, w3, s3, b3, ssc, bsc)


def bottleneck_nchw(x_nchw, kernel_params):
    """PyTorch-layout convenience wrapper.  The transposes cost an extra HBM pass;
    prefer keeping the model NHWC end-to-end and calling bottleneck_nhwc."""
    y = bottleneck_nhwc(jnp.transpose(x_nchw, (0, 2, 3, 1)), kernel_params)
    return jnp.transpose(y, (0, 3, 1, 2))


# --------------------------------------------------------------------------
# Parameter construction (eval-mode BN folded into scale/bias)
# --------------------------------------------------------------------------

def _fold_bn(key, c, eps=1e-5):
    kg, kb, km, kv = jax.random.split(key, 4)
    gamma = 1.0 + 0.1 * jax.random.normal(kg, (c,), jnp.float32)
    beta = 0.1 * jax.random.normal(kb, (c,), jnp.float32)
    mean = 0.1 * jax.random.normal(km, (c,), jnp.float32)
    var = jnp.abs(jax.random.normal(kv, (c,), jnp.float32)) + 0.5
    scale = gamma / jnp.sqrt(var + eps)
    bias = beta - mean * scale
    return scale.reshape(1, c), bias.reshape(1, c)


def make_params(key, in_planes, planes):
    expansion = 4
    ks = jax.random.split(key, 9)
    p = {}
    p['w1'] = 0.1 * jax.random.normal(ks[0], (in_planes, planes), jnp.float32)
    p['w2'] = 0.1 * jax.random.normal(ks[1], (3, 3, planes, planes), jnp.float32)
    p['w3'] = 0.1 * jax.random.normal(ks[2], (planes, expansion * planes), jnp.float32)
    p['wsc'] = 0.1 * jax.random.normal(ks[3], (in_planes, expansion * planes), jnp.float32)
    p['cb_sc'] = 0.1 * jax.random.normal(ks[4], (expansion * planes,), jnp.float32)
    p['s1'], p['b1'] = _fold_bn(ks[5], planes)
    p['s2'], p['b2'] = _fold_bn(ks[6], planes)
    p['s3'], p['b3'] = _fold_bn(ks[7], expansion * planes)
    p['ssc'], p['bsc'] = _fold_bn(ks[8], expansion * planes)
    return p


def pack_params(p):
    """Fuse/reshape/cast the raw f32 params into the kernel's bf16 layout."""
    planes = p['w1'].shape[1]
    # [wsc | w1] so the (usually 128-multiple) Cout slice of the fused matmul
    # result starts at lane 0 (vreg-aligned split).
    wcat = jnp.concatenate([p['wsc'], p['w1']], axis=1).astype(jnp.bfloat16)
    w2k = p['w2'].reshape(3, 3 * planes, planes).astype(jnp.bfloat16)   # rows: [dx0|dx1|dx2]
    w3 = p['w3'].astype(jnp.bfloat16)
    bsc = p['bsc'] + p['ssc'] * p['cb_sc'].reshape(1, -1)               # fold shortcut conv bias
    return (wcat, p['s1'], p['b1'], w2k, p['s2'], p['b2'],
            w3, p['s3'], p['b3'], p['ssc'], bsc)


# --------------------------------------------------------------------------
# Pure-JAX reference (mimics the kernel's bf16-input / f32-accumulate matmuls)
# --------------------------------------------------------------------------

def _bf16_round(a):
    return a.astype(jnp.bfloat16).astype(jnp.float32)


def reference_nhwc(x, p):
    xb = _bf16_round(x)
    mm = lambda a, w: jnp.einsum('nhwc,cd->nhwd', a, _bf16_round(w))
    h1 = jax.nn.relu(mm(xb, p['w1']) * p['s1'] + p['b1'])
    h2 = jax.lax.conv_general_dilated(
        _bf16_round(h1), _bf16_round(p['w2']), (1, 1), 'SAME',
        dimension_numbers=('NHWC', 'HWIO', 'NHWC'))
    h2 = jax.nn.relu(h2 * p['s2'] + p['b2'])
    h3 = mm(_bf16_round(h2), p['w3']) * p['s3'] + p['b3']
    sc = (mm(xb, p['wsc']) + p['cb_sc']) * p['ssc'] + p['bsc']
    return jax.nn.relu(h3 + sc)


# --------------------------------------------------------------------------

if __name__ == "__main__":
    key = jax.random.PRNGKey(0)
    kx, kp = jax.random.split(key)

    # Small but lane-friendly config: Cout = 4*planes = 128 -> unmasked output stores.
    N, in_planes, planes, H, W = 2, 64, 32, 16, 16
    x_nhwc = jax.random.normal(kx, (N, H, W, in_planes), jnp.float32)

    raw_params = make_params(kp, in_planes, planes)
    kernel_params = pack_params(raw_params)

    out = bottleneck_nhwc(x_nhwc, kernel_params)
    out = jax.block_until_ready(out)

    ref = reference_nhwc(x_nhwc, raw_params)
    np.testing.assert_allclose(np.asarray(out), np.asarray(ref),
                               rtol=2e-3, atol=2e-3)

    print("KERNEL_OK")
</pallas_src>

<mosaic_0001>
module attributes {stable_mosaic.version = 11 : i64} {
  func.func @_roll_probe_kernel(%arg0: memref<8x128xf32, #tpu.memory_space<vmem>>, %arg1: memref<8x128xf32, #tpu.memory_space<vmem>>) attributes {dimension_semantics = [], scalar_prefetch = 0 : i64, scratch_operands = 0 : i64, tpu.core_type = #tpu.core_type<tc>} {
    %c0 = arith.constant 0 : index
    %c0_0 = arith.constant 0 : index
    %0 = vector.load %arg0[%c0, %c0_0] : memref<8x128xf32, #tpu.memory_space<vmem>>, vector<8x128xf32>
    %c1_i32 = arith.constant 1 : i32
    %1 = tpu.dynamic_rotate %0 by %c1_i32 dim 0 : vector<8x128xf32>, i32 -> vector<8x128xf32>
    %c0_1 = arith.constant 0 : index
    %c0_2 = arith.constant 0 : index
    %2 = vector.load %arg1[%c0_1, %c0_2] : memref<8x128xf32, #tpu.memory_space<vmem>>, vector<8x128xf32>
    tpu.vector_store %arg1[%c0_1, %c0_2], %1 {strides = array<i32>} : memref<8x128xf32, #tpu.memory_space<vmem>>, vector<8x128xf32>,
    return
  }
}

</mosaic_0001>

<bundles_post_ra>
// kernel: tpu_custom_call.1
= control target key start
LH: loop header
LB: loop body
LE: loop exit
PB: predicated region body
PF: predicated region fallthrough
CT: control target
= control target key end

     0   :  { %6 = vsyncpa [#allocation3], 0  ;;  %s103_s0 = inlined_call_operand.hbm [shape: f32[8,128], index: 0, kind: input, shape index: {}]   ;;  %s104_s1 = inlined_call_operand.hbm [shape: f32[8,128], index: 1, kind: output, shape index: {}]  }
   0x1   :  { %7 = vsyncpa [#allocation4], 0  ;;  %s85_s6 = smov [#allocation2]  }
   0x2   :  { %s14_s7 = sshll.u32 %s85_s6, 4  ;;  %s15_s7 = int_to_ptr.vmem [resolvable:$true] %s14_s7 }
   0x3   :  { %s49_s8 = scalar_lea.vmem %s15_s7, 128  ;;  %p54_p1 = scmp.lt.s32.totalorder %s15_s7, %s15_s7 }
   0x4   :  { %p50_p0 = scmp.ne.s32.totalorder %s15_s7, %s49_s8  ;;  %p55_p2 = scmp.lt.s32.totalorder %s49_s8, %s49_s8 }
   0x6   :  { %p56_p3 = por %p55_p2, %p54_p1 }
   0x8   :  { %p57_p4 = pnand %p56_p3, %p50_p0 }
   0xa   :  { %60 = shalt.err (!%p57_p4)
}
   0xb   :  { %17 = dma.hbm_to_vmem [thread:$0]  %s103_s0, 128, %s15_s7, [#allocation3]  }
   0xc   :  { %81 = dma.done.wait [#allocation3], 128  }
   0xd   :  { %82 = vsyncadd [#allocation3], 4294967168  ;;  %s86_s11 = smov [#allocation5]   ;;  %v21_v0 = vld [vmem:[#allocation2] sm:$0xff] }
   0xe   :  { %s30_s12 = sshll.u32 %s86_s11, 4  ;;  %v22_v1 = vrot.slane %v21_v0, 7  ;;  %s31_s12 = int_to_ptr.vmem [resolvable:$true] %s30_s12 }
   0xf   :  { %s61_s13 = scalar_lea.vmem %s31_s12, 128  ;;  %p66_p6 = scmp.lt.s32.totalorder %s31_s12, %s31_s12 }
  0x10   :  { %23 = vst [vmem:[#allocation5] sm:$0xff] %v22_v1  ;;  %p62_p5 = scmp.ne.s32.totalorder %s31_s12, %s61_s13  ;;  %p67_p7 = scmp.lt.s32.totalorder %s61_s13, %s61_s13 }
  0x12   :  { %p68_p8 = por %p67_p7, %p66_p6 }
  0x14   :  { %p69_p9 = pnand %p68_p8, %p62_p5 }
  0x16   :  { %72 = shalt.err (!%p69_p9)
}
  0x17   :  { %33 = dma.vmem_to_hbm [thread:$0]  %s31_s12, 128, %s104_s1, [#allocation4]  }
  0x18   :  { %83 = dma.done.wait [#allocation4], 128  }
  0x19   :  { %84 = vsyncadd [#allocation4], 4294967168 }
  0x1a   :  { %37 = vsyncpa [#allocation3], 1 }
  0x1b   :  { %38 = vsyncpa [#allocation4], 1 }

</bundles_post_ra>
